<compile_context>
chip_gen: v7x
topology: tpu7x:2x2x1
jax: 0.10.0
libtpu: 0.0.40
codegen_flags: <defaults>
</compile_context>

<pallas_src>
import functools
import math

import jax
import jax.numpy as jnp
from jax.experimental import pallas as pl
from jax.experimental.pallas import tpu as pltpu


# Default (maximum) tile sizes; clamped per-shape / per-VMEM-budget below.
_TM_DEFAULT = 512
_TN_DEFAULT = 512
_TK_DEFAULT = 2048


def _round_up(v, m):
    return ((v + m - 1) // m) * m


def _sublane_multiple(dtype):
    # Native sublane packing: 8 rows for 4-byte, 16 for 2-byte, 32 for 1-byte.
    return max(8, 32 // jnp.dtype(dtype).itemsize)


@functools.lru_cache(maxsize=None)
def _vmem_budget_bytes():
    """Generation-aware VMEM limit (leave ~8 MiB headroom, cap at ~100 MiB)."""
    try:
        cap = pltpu.get_tpu_info().vmem_capacity_bytes
    except Exception:  # no TPU info available -> assume smallest (v7x, 64 MiB)
        cap = 64 * 1024 * 1024
    return min(100 * 1024 * 1024, cap - 8 * 1024 * 1024)


def _choose_tiles(M, K, N, dtype, tm=None, tn=None, tk=None):
    """Pick (tm, tn, tk) clamped to the problem and to the VMEM budget."""
    itemsize = jnp.dtype(dtype).itemsize
    sub = _sublane_multiple(dtype)
    tm = min(tm or _TM_DEFAULT, _round_up(M, sub))
    tk = min(tk or _TK_DEFAULT, _round_up(K, 128))
    tn = min(tn or _TN_DEFAULT, _round_up(N, 128))

    budget = _vmem_budget_bytes()

    def footprint(tm_, tn_, tk_):
        # double-buffered x / W^T / out tiles + f32 accumulator scratch
        return 2 * (tm_ * tk_ + tk_ * tn_ + tm_ * tn_) * itemsize + tm_ * tn_ * 4

    # Shrink tk, then tn, then tm until we fit the per-generation budget.
    while footprint(tm, tn, tk) > budget and tk > 128:
        tk = max(128, _round_up(tk // 2, 128))
    while footprint(tm, tn, tk) > budget and tn > 128:
        tn = max(128, _round_up(tn // 2, 128))
    while footprint(tm, tn, tk) > budget and tm > sub:
        tm = max(sub, _round_up(tm // 2, sub))

    return tm, tn, tk, budget


def _linear_kernel(x_ref, wt_ref, b_ref, o_ref, acc_ref):
    # x_ref: (tm, tk)  wt_ref: (tk, tn)  b_ref: (Np//tn, tn) resident
    # o_ref: (tm, tn)  acc_ref: (tm, tn) f32 scratch
    j = pl.program_id(1)
    k = pl.program_id(2)

    @pl.when(k == 0)
    def _init():
        # Fold bias into the accumulator init (no per-K-step bias add).
        # The whole padded bias is resident; pick this N-tile's row.
        b = b_ref[pl.ds(j, 1), :].astype(jnp.float32)          # (1, tn)
        acc_ref[...] = jnp.broadcast_to(b, acc_ref.shape)

    acc_ref[...] += jnp.dot(
        x_ref[...], wt_ref[...], preferred_element_type=jnp.float32
    )

    @pl.when(k == pl.num_programs(2) - 1)
    def _store():
        o_ref[...] = acc_ref[...].astype(o_ref.dtype)


def prepare_parallel_layer_params(weight, bias):
    """One-time layout transform (call at init, NOT per forward):

    weight (out_features, in_features) -> W^T padded to (Kp, Np)
    bias   (out_features,)             -> padded to (Np,)

    Padding/transpose is done once here so forward() never re-reads/re-writes
    the full weight in HBM before the kernel runs.
    """
    out_features, in_features = weight.shape
    _, tn, tk, _ = _choose_tiles(_TM_DEFAULT, in_features, out_features,
                                 weight.dtype)
    Kp, Np = _round_up(in_features, tk), _round_up(out_features, tn)

    wt = weight.T                                    # (K, N)
    if (Kp, Np) != (in_features, out_features):
        wt = jnp.pad(wt, ((0, Kp - in_features), (0, Np - out_features)))
    b = bias
    if Np != out_features:
        b = jnp.pad(b, (0, Np - out_features))
    return wt, b


@functools.partial(jax.jit, static_argnames=("out_features", "tm", "tn", "tk"))
def parallel_layer_forward(x, wt, bias, *, out_features, tm=None, tn=None, tk=None):
    """x: (batch, seq, in_features) -> (batch, seq, out_features).

    Equivalent to the single-device (dim=None) ParallelLayer.forward:
        y = x @ weight.T + bias
    `wt` is the pre-transposed (and optionally pre-padded) weight, i.e.
    `prepare_parallel_layer_params(weight, bias)` output (weight.T also works).
    Output dtype follows x.dtype (bf16 in -> bf16 out, f32 accumulation).
    """
    *lead, K = x.shape
    M = 1
    for d in lead:
        M *= d
    Kw, Nw = wt.shape
    assert K <= Kw, "x inner dim larger than (padded) weight inner dim"
    assert bias.shape[0] <= Nw

    # Tiles chosen from the (already padded) weight dims -> consistent with
    # prepare_parallel_layer_params, so wt/bias padding below is a no-op.
    tm, tn, tk, vmem_limit = _choose_tiles(M, Kw, Nw, x.dtype, tm, tn, tk)

    Mp, Kp, Np = _round_up(M, tm), _round_up(Kw, tk), _round_up(Nw, tn)

    # Megacore (v7x has 2 TensorCores): if both parallel axes collapsed to a
    # single block, split N so both cores get work. No-op on v5e/v6e.
    if Mp // tm == 1 and Np // tn == 1 and Np >= 256 and (Np // 2) % 128 == 0:
        tn = Np // 2

    # Pad only when strictly needed (pre-prepared weights hit the no-pad path).
    x2d = x.reshape(M, K)
    if (Mp, Kp) != (M, K):
        x2d = jnp.pad(x2d, ((0, Mp - M), (0, Kp - K)))
    if (Kp, Np) != (Kw, Nw):
        wt = jnp.pad(wt, ((0, Kp - Kw), (0, Np - Nw)))
    if bias.shape[0] != Np:
        bias = jnp.pad(bias, (0, Np - bias.shape[0]))
    b2d = bias.reshape(Np // tn, tn)                 # one row per N tile

    grid_m, grid_n, grid_k = Mp // tm, Np // tn, Kp // tk
    grid = (grid_m, grid_n, grid_k)

    nbytes = lambda a: a.size * a.dtype.itemsize
    cost = pl.CostEstimate(
        flops=2 * M * Nw * K,
        transcendentals=0,
        # Actual HBM traffic including re-streaming: x read once per N tile,
        # W^T read once per M tile, plus bias and the output write.
        bytes_accessed=nbytes(x2d) * grid_n + nbytes(wt) * grid_m
        + nbytes(b2d) + M * Nw * x.dtype.itemsize,
    )

    out2d = pl.pallas_call(
        _linear_kernel,
        out_shape=jax.ShapeDtypeStruct((Mp, Np), x.dtype),
        grid_spec=pltpu.PrefetchScalarGridSpec(
            num_scalar_prefetch=0,
            grid=grid,
            in_specs=[
                pl.BlockSpec((tm, tk), lambda i, j, k: (i, k)),      # x tile
                pl.BlockSpec((tk, tn), lambda i, j, k: (k, j)),      # W^T tile
                pl.BlockSpec((Np // tn, tn), lambda i, j, k: (0, 0)),  # bias, resident
            ],
            out_specs=pl.BlockSpec((tm, tn), lambda i, j, k: (i, j)),
            scratch_shapes=[pltpu.VMEM((tm, tn), jnp.float32)],
        ),
        compiler_params=pltpu.CompilerParams(
            dimension_semantics=("parallel", "parallel", "arbitrary"),
            vmem_limit_bytes=vmem_limit,
        ),
        cost_estimate=cost,
    )(x2d, wt, b2d)

    return out2d[:M, :out_features].reshape(*lead, out_features)


def init_parallel_layer_params(key, in_features, out_features, dtype=jnp.float32):
    """Deterministic re-implementation of reset_params():
    kaiming_uniform_(weight, a=sqrt(5)) and uniform bias in [-1/sqrt(fan_in), ...]."""
    kw, kb = jax.random.split(key)
    fan_in = in_features
    gain = math.sqrt(2.0 / (1.0 + 5.0))          # a = sqrt(5)
    w_bound = gain * math.sqrt(3.0 / fan_in)
    weight = jax.random.uniform(
        kw, (out_features, in_features), dtype=dtype, minval=-w_bound, maxval=w_bound
    )
    b_bound = 1.0 / math.sqrt(fan_in)
    bias = jax.random.uniform(
        kb, (out_features,), dtype=dtype, minval=-b_bound, maxval=b_bound
    )
    return weight, bias


if __name__ == "__main__":
    key = jax.random.PRNGKey(0)
    k_x, k_p = jax.random.split(key)

    batch, seq = 2, 8
    in_features, out_features = 32, 64

    x = jax.random.normal(k_x, (batch, seq, in_features), dtype=jnp.float32)
    weight, bias = init_parallel_layer_params(k_p, in_features, out_features)

    # One-time parameter layout transform (transpose + pad), done at init.
    wt, b = prepare_parallel_layer_params(weight, bias)

    y = parallel_layer_forward(x, wt, b, out_features=out_features)
    y = jax.block_until_ready(y)

    # sanity check against pure-JAX reference of the same forward
    y_ref = x @ weight.T + bias
    assert y.shape == (batch, seq, out_features)
    assert jnp.allclose(y, y_ref, atol=1e-5, rtol=1e-5)

    print("KERNEL_OK")
</pallas_src>

<mosaic_0001>
module attributes {stable_mosaic.version = 11 : i64} {
  func.func @_linear_kernel(%arg0: i32, %arg1: i32, %arg2: i32, %arg3: memref<16x128xf32, #tpu.memory_space<vmem>>, %arg4: memref<128x128xf32, #tpu.memory_space<vmem>>, %arg5: memref<1x128xf32, #tpu.memory_space<vmem>>, %arg6: memref<16x128xf32, #tpu.memory_space<vmem>>, %arg7: memref<16x128xf32, #tpu.memory_space<vmem>>) attributes {dimension_semantics = [#tpu.dimension_semantics<parallel>, #tpu.dimension_semantics<parallel>, #tpu.dimension_semantics<arbitrary>], iteration_bounds = array<i64: 1, 1, 1>, scalar_prefetch = 0 : i64, scratch_operands = 1 : i64, tpu.core_type = #tpu.core_type<tc>, window_params = [{transform_indices = @transform_0, window_bounds = array<i64: 16, 128>}, {transform_indices = @transform_1, window_bounds = array<i64: 128, 128>}, {pipeline_mode = #tpu.pipeline_mode<synchronous>, transform_indices = @transform_2, window_bounds = array<i64: 1, 128>}, {transform_indices = @transform_3, window_bounds = array<i64: 16, 128>}]} {
    %c0_i32 = arith.constant 0 : i32
    %0 = arith.cmpi eq, %arg2, %c0_i32 : i32
    %1 = arith.extui %0 : i1 to i32
    %c0_i32_0 = arith.constant 0 : i32
    %2 = arith.cmpi ne, %1, %c0_i32_0 : i32
    scf.if %2 {
      %12 = arith.index_cast %arg1 : i32 to index
      %c0_10 = arith.constant 0 : index
      %13 = vector.load %arg5[%12, %c0_10] : memref<1x128xf32, #tpu.memory_space<vmem>>, vector<1x128xf32>
      %14 = vector.shape_cast %13 : vector<1x128xf32> to vector<1x128xf32>
      %15 = vector.broadcast %14 : vector<1x128xf32> to vector<16x128xf32>
      %c0_11 = arith.constant 0 : index
      %c0_12 = arith.constant 0 : index
      %16 = vector.load %arg7[%c0_11, %c0_12] : memref<16x128xf32, #tpu.memory_space<vmem>>, vector<16x128xf32>
      tpu.vector_store %arg7[%c0_11, %c0_12], %15 {strides = array<i32>} : memref<16x128xf32, #tpu.memory_space<vmem>>, vector<16x128xf32>,
    } else {
    }
    %c0 = arith.constant 0 : index
    %c0_1 = arith.constant 0 : index
    %3 = vector.load %arg7[%c0, %c0_1] : memref<16x128xf32, #tpu.memory_space<vmem>>, vector<16x128xf32>
    %c0_2 = arith.constant 0 : index
    %c0_3 = arith.constant 0 : index
    %4 = vector.load %arg3[%c0_2, %c0_3] : memref<16x128xf32, #tpu.memory_space<vmem>>, vector<16x128xf32>
    %c0_4 = arith.constant 0 : index
    %c0_5 = arith.constant 0 : index
    %5 = vector.load %arg4[%c0_4, %c0_5] : memref<128x128xf32, #tpu.memory_space<vmem>>, vector<128x128xf32>
    %cst = arith.constant dense<0.000000e+00> : vector<16x128xf32>
    %6 = tpu.matmul %4, %5, %cst {dimension_numbers = #tpu.dot_dimension_numbers<[1], [0], [0], [1], [0, 0, 1, 1], [], []>} : vector<16x128xf32>, vector<128x128xf32>, vector<16x128xf32> -> vector<16x128xf32>
    %7 = arith.addf %3, %6 : vector<16x128xf32>
    %c0_6 = arith.constant 0 : index
    %c0_7 = arith.constant 0 : index
    %8 = vector.load %arg7[%c0_6, %c0_7] : memref<16x128xf32, #tpu.memory_space<vmem>>, vector<16x128xf32>
    tpu.vector_store %arg7[%c0_6, %c0_7], %7 {strides = array<i32>} : memref<16x128xf32, #tpu.memory_space<vmem>>, vector<16x128xf32>,
    %c0_i32_8 = arith.constant 0 : i32
    %9 = arith.cmpi eq, %arg2, %c0_i32_8 : i32
    %10 = arith.extui %9 : i1 to i32
    %c0_i32_9 = arith.constant 0 : i32
    %11 = arith.cmpi ne, %10, %c0_i32_9 : i32
    scf.if %11 {
      %c0_10 = arith.constant 0 : index
      %c0_11 = arith.constant 0 : index
      %12 = vector.load %arg7[%c0_10, %c0_11] : memref<16x128xf32, #tpu.memory_space<vmem>>, vector<16x128xf32>
      %c0_12 = arith.constant 0 : index
      %c0_13 = arith.constant 0 : index
      %13 = vector.load %arg6[%c0_12, %c0_13] : memref<16x128xf32, #tpu.memory_space<vmem>>, vector<16x128xf32>
      tpu.vector_store %arg6[%c0_12, %c0_13], %12 {strides = array<i32>} : memref<16x128xf32, #tpu.memory_space<vmem>>, vector<16x128xf32>,
    } else {
    }
    return
  }
  func.func @transform_0(%arg0: i32, %arg1: i32, %arg2: i32) -> (i32, i32) {
    %c0_i32 = arith.constant 0 : i32
    return %arg0, %arg2 : i32, i32
  }
  func.func @transform_1(%arg0: i32, %arg1: i32, %arg2: i32) -> (i32, i32) {
    %c0_i32 = arith.constant 0 : i32
    return %arg2, %arg1 : i32, i32
  }
  func.func @transform_2(%arg0: i32, %arg1: i32, %arg2: i32) -> (i32, i32) {
    %c0_i32 = arith.constant 0 : i32
    %c0_i32_0 = arith.constant 0 : i32
    %c0_i32_1 = arith.constant 0 : i32
    return %c0_i32, %c0_i32_0 : i32, i32
  }
  func.func @transform_3(%arg0: i32, %arg1: i32, %arg2: i32) -> (i32, i32) {
    %c0_i32 = arith.constant 0 : i32
    return %arg0, %arg1 : i32, i32
  }
}

</mosaic_0001>

<bundles_post_ra>
// kernel: parallel_layer_forward.1
= control target key start
LH: loop header
LB: loop body
LE: loop exit
PB: predicated region body
PF: predicated region fallthrough
CT: control target
= control target key end

     0   :  { %8 = vsyncpa [#allocation4], 0  ;;  %s265_s12 = smov [#allocation3]   ;;  %s315_s0 = inlined_call_operand.vmem [shape: f32[16,128], index: 0, kind: input, shape index: {}]   ;;  %s316_s1 = inlined_call_operand.hbm [shape: f32[128,128], index: 1, kind: input, shape index: {}]   ;;  %s317_s2 = inlined_call_operand.vmem [shape: f32[1,128], index: 2, kind: input, shape index: {}]   ;;  %s318_s3 = inlined_call_operand.vmem [shape: f32[16,128], index: 3, kind: output, shape index: {}]  }
   0x1   :  { %s16_s13 = sshll.u32 %s265_s12, 4  ;;  %s241_s16 = scalar_lea.hbm %s316_s1, 2048  ;;  %s17_s13 = int_to_ptr.vmem [resolvable:$true] %s16_s13 }
   0x2   :  { %p242_p0 = scmp.ne.s32.totalorder %s316_s1, %s241_s16  ;;  %p245_p1 = scmp.lt.u32.totalorder %s241_s16, %s316_s1 }
   0x4   :  { %p247_p2 = pnand %p245_p1, %p242_p0 }
   0x6   :  { %250 = shalt.err (!%p247_p2)
}
   0x7   :  { %s251_s21 = scalar_lea.vmem %s17_s13, 2048  ;;  %p256_p4 = scmp.lt.s32.totalorder %s17_s13, %s17_s13 }
   0x8   :  { %p252_p3 = scmp.ne.s32.totalorder %s17_s13, %s251_s21  ;;  %p257_p5 = scmp.lt.s32.totalorder %s251_s21, %s251_s21 }
   0xa   :  { %p258_p6 = por %p257_p5, %p256_p4 }
   0xc   :  { %p259_p7 = pnand %p258_p6, %p252_p3 }
   0xe   :  { %262 = shalt.err (!%p259_p7)
}
   0xf   :  { %s266_s22 = smov 128   ;;  %s267_s23 = smov 8  }
  0x10   :  { %22 = dma.hbm_to_vmem [thread:$0]  %s316_s1, 2048, %s17_s13, [#allocation4], %s266_s22, %s266_s22, %s267_s23  }
  0x11   :  { %263 = dma.done.wait [#allocation4], 2048  }
  0x12   :  { %264 = vsyncadd [#allocation4], 4294965248  ;;  %v45_v0 = vld [vmem:[#allocation3] sm:$0xff]  ;;  %v46_v1 = vld [vmem:[#allocation3 + $0x8] sm:$0xff] }
  0x13   :  { %v47_v2 = vld [vmem:[#allocation3 + $0x10] sm:$0xff]  ;;  %v206_v3 = vpack.c.bf16 %v46_v1, %v45_v0  ;;  %v48_v4 = vld [vmem:[#allocation3 + $0x18] sm:$0xff]  ;;  %v49_v6 = vld [vmem:[#allocation3 + $0x20] sm:$0xff] }
  0x14   :  { %v210_v5 = vpack.c.bf16 %v48_v4, %v47_v2  ;;  %v50_v7 = vld [vmem:[#allocation3 + $0x28] sm:$0xff]  ;;  %v43_v9 = vld [vmem:[%s315_s0] sm:$0xff]  ;;  %v51_v10 = vld [vmem:[#allocation3 + $0x30] sm:$0xff] }
  0x15   :  { %207 = vmatprep.subr.bf16.mxu0 %v206_v3  ;;  %v214_v8 = vpack.c.bf16 %v50_v7, %v49_v6  ;;  %v52_v11 = vld [vmem:[#allocation3 + $0x38] sm:$0xff]  ;;  %203 = vmatprep.mubr.f32.mxu0 %v43_v9  ;;  %v53_v13 = vld [vmem:[#allocation3 + $0x40] sm:$0xff]  ;;  %v54_v14 = vld [vmem:[#allocation3 + $0x48] sm:$0xff] }
  0x16   :  { %209 = vmatpush3.bf16.msra.mxu0 %v206_v3  ;;  %v218_v12 = vpack.c.bf16 %v52_v11, %v51_v10  ;;  %v222_v15 = vpack.c.bf16 %v54_v14, %v53_v13  ;;  %v55_v16 = vld [vmem:[#allocation3 + $0x50] sm:$0xff]  ;;  %v56_v17 = vld [vmem:[#allocation3 + $0x58] sm:$0xff]  ;;  %v57_v19 = vld [vmem:[#allocation3 + $0x60] sm:$0xff] }
  0x17   :  { %211 = vmatprep.subr.bf16.mxu0 %v210_v5  ;;  %v226_v18 = vpack.c.bf16 %v56_v17, %v55_v16  ;;  %v58_v20 = vld [vmem:[#allocation3 + $0x68] sm:$0xff]  ;;  %v59_v22 = vld [vmem:[#allocation3 + $0x70] sm:$0xff]  ;;  %v60_v23 = vld [vmem:[#allocation3 + $0x78] sm:$0xff] }
  0x18   :  { %v230_v21 = vpack.c.bf16 %v58_v20, %v57_v19  ;;  %v234_v24 = vpack.c.bf16 %v60_v23, %v59_v22  ;;  %v44_v25 = vld [vmem:[%s315_s0 + $0x8] sm:$0xff]  ;;  %v152_v26 = vld [vmem:[%s317_s2] ss:$0 sm:$0xff] }
  0x1a   :  { %213 = vmatpush3.bf16.msra.mxu0 %v210_v5 }
  0x1b   :  { %215 = vmatprep.subr.bf16.mxu0 %v214_v8 }
  0x1e   :  { %217 = vmatpush3.bf16.msra.mxu0 %v214_v8 }
  0x1f   :  { %219 = vmatprep.subr.bf16.mxu0 %v218_v12 }
  0x22   :  { %221 = vmatpush3.bf16.msra.mxu0 %v218_v12 }
  0x23   :  { %223 = vmatprep.subr.bf16.mxu0 %v222_v15 }
  0x26   :  { %225 = vmatpush3.bf16.msra.mxu0 %v222_v15 }
  0x27   :  { %227 = vmatprep.subr.bf16.mxu0 %v226_v18 }
  0x2a   :  { %229 = vmatpush3.bf16.msra.mxu0 %v226_v18 }
  0x2b   :  { %231 = vmatprep.subr.bf16.mxu0 %v230_v21 }
  0x2e   :  { %233 = vmatpush3.bf16.msra.mxu0 %v230_v21 }
  0x2f   :  { %235 = vmatprep.subr.bf16.mxu0 %v234_v24 }
  0x32   :  { %237 = vmatpush3.bf16.msra.mxu0 %v234_v24 }
  0x35   :  { %204 = vmatmul.mubr.f32.vlgmr.msra.gmra.mrb[0].mxu0 %v44_v25 }
 0x108   :  { %v205_v27 = vpop.f32.mrb[0].mxu0 }
 0x109   :  { %v137_v28 = vadd.f32 %v205_v27, %v152_v26  ;;  %v127_v29 = vpop.f32.mrb[1].mxu0 }
 0x10a   :  { %v136_v30 = vadd.f32 %v152_v26, %v127_v29 }
 0x10b   :  { %146 = vst [vmem:[%s318_s3 + $0x8] sm:$0xff] %v137_v28 }
 0x10c   :  { %145 = vst [vmem:[%s318_s3] sm:$0xff] %v136_v30 }
 0x10d   :  { %151 = vsyncpa [#allocation4], 1 }

</bundles_post_ra>
